<compile_context>
chip_gen: v5e
topology: v5e:2x2
jax: 0.10.0
libtpu: 0.0.40
codegen_flags: <defaults>
</compile_context>

<pallas_src>
import jax
import jax.numpy as jnp
from jax import lax
from jax.experimental import pallas as pl
from jax.experimental.pallas import tpu as pltpu


BN_EPS = 1e-5
H1, H2 = 32, 16                       # hidden widths fixed by the module
VMEM_LIMIT_BYTES = 32 * 1024 * 1024   # raises v5e's 16 MiB default, <= v7x physical


# ---------------------------------------------------------------------------
# kernels
# ---------------------------------------------------------------------------
def _encoder_kernel(ptfs_ref, we_ref, be_ref, out_ref):
    # factors = ptfs @ We^T + be : (T, P) @ (P, F) -> (T, F); tiny, single block.
    out_ref[...] = (
        jnp.dot(ptfs_ref[...], we_ref[...], preferred_element_type=jnp.float32)
        + be_ref[...])


def _stats1_kernel(char_ref, w1_ref, b1_ref, sum_ref, sq_ref):
    # Per-time-step partial sums for the (global) BN1 batch statistics.
    x = char_ref[0]                                                   # (N, Pc)
    h = jnp.dot(x, w1_ref[...], preferred_element_type=jnp.float32) + b1_ref[...]
    sum_ref[0] = jnp.sum(h, axis=0, keepdims=True)                    # (1, H1)
    sq_ref[0] = jnp.sum(h * h, axis=0, keepdims=True)                 # (1, H1)


def _stats2_kernel(char_ref, w1_ref, b1_ref, scale1_ref, shift1_ref,
                   w2_ref, b2_ref, sum_ref, sq_ref):
    # Recompute layer 1 (cheap), apply folded BN1 + ReLU, partial sums for BN2.
    x = char_ref[0]                                                   # (N, Pc)
    h1 = jnp.dot(x, w1_ref[...], preferred_element_type=jnp.float32) + b1_ref[...]
    a1 = jnp.maximum(h1 * scale1_ref[...] + shift1_ref[...], 0.0)
    h2 = (jnp.dot(a1.astype(w2_ref.dtype), w2_ref[...],
                  preferred_element_type=jnp.float32) + b2_ref[...])
    sum_ref[0] = jnp.sum(h2, axis=0, keepdims=True)                   # (1, H2)
    sq_ref[0] = jnp.sum(h2 * h2, axis=0, keepdims=True)               # (1, H2)


def _forward_kernel(char_ref, fac_ref,
                    w1_ref, b1_ref, scale1_ref, shift1_ref,
                    w2_ref, b2_ref, scale2_ref, shift2_ref,
                    w3_ref, b3_ref, out_ref):
    x = char_ref[0]                                                   # (N, Pc)
    h1 = jnp.dot(x, w1_ref[...], preferred_element_type=jnp.float32) + b1_ref[...]
    a1 = jnp.maximum(h1 * scale1_ref[...] + shift1_ref[...], 0.0)
    h2 = (jnp.dot(a1.astype(w2_ref.dtype), w2_ref[...],
                  preferred_element_type=jnp.float32) + b2_ref[...])
    a2 = jnp.maximum(h2 * scale2_ref[...] + shift2_ref[...], 0.0)
    loadings = (jnp.dot(a2.astype(w3_ref.dtype), w3_ref[...],
                        preferred_element_type=jnp.float32) + b3_ref[...])  # (N, F)
    fac = fac_ref[0]                                                  # (1, F)
    # loadings @ factors for this time step as one lane-dense (1, N) row:
    # (1, F) . (N, F)^T, contracting the tiny factor dimension.
    out_ref[0] = lax.dot_general(
        fac, loadings,
        dimension_numbers=(((1,), (1,)), ((), ())),
        preferred_element_type=jnp.float32)


# ---------------------------------------------------------------------------
# wrapper
# ---------------------------------------------------------------------------
def ae2_forward(char, ptfs, params, *, matmul_dtype=jnp.float32):
    """char: (T, N, Pc) f32, ptfs: (T, P) f32 -> (T, N) f32.

    matmul_dtype=jnp.bfloat16 halves the dominant char HBM traffic (f32
    accumulation and f32 BN stats are kept); default f32 matches PyTorch.
    """
    T, N, Pc = char.shape
    TN = T * N
    F = params["w3"].shape[0]
    f32 = jnp.float32

    # Pre-transposed / row-vector parameters (kernels do plain x @ W).
    w1 = params["w1"].T.astype(matmul_dtype)             # (Pc, H1)
    w2 = params["w2"].T.astype(matmul_dtype)             # (H1, H2)
    w3 = params["w3"].T.astype(matmul_dtype)             # (H2, F)
    we = params["we"].T.astype(f32)                      # (P,  F)
    b1 = params["b1"].reshape(1, H1).astype(f32)
    b2 = params["b2"].reshape(1, H2).astype(f32)
    b3 = params["b3"].reshape(1, F).astype(f32)
    be = params["be"].reshape(1, F).astype(f32)

    # TODO(synk): nn.Dropout(0.2) has no PyTorch-RNG-compatible Pallas equivalent;
    # applied as identity (eval semantics).
    char_c = char.astype(matmul_dtype)                    # (T, N, Pc)

    grid_params = pltpu.CompilerParams(
        dimension_semantics=("parallel",),                # t-parallel: 2 TCs on v7x
        vmem_limit_bytes=VMEM_LIMIT_BYTES)

    # One time step (N asset rows) per grid step. For very small N one could
    # batch several t per block; per-t blocks keep the factor broadcast trivial.
    char_spec = pl.BlockSpec((1, N, Pc), lambda t: (t, 0, 0))

    def const_spec(shape):                                # small VMEM-resident params
        return pl.BlockSpec(shape, lambda t: tuple(0 for _ in shape))

    # ---- factor network: tiny single-block matmul -------------------------
    factors = pl.pallas_call(
        _encoder_kernel,
        out_shape=jax.ShapeDtypeStruct((T, F), f32),
        in_specs=[pl.BlockSpec(memory_space=pltpu.MemorySpace.VMEM)] * 3,
        out_specs=pl.BlockSpec(memory_space=pltpu.MemorySpace.VMEM),
    )(ptfs.astype(f32), we, be)
    factors3 = factors.reshape(T, 1, F)                   # one (1, F) row per t

    # ---- pass 1: global BN1 batch statistics ------------------------------
    stat1_spec = pl.BlockSpec((1, 1, H1), lambda t: (t, 0, 0))
    s1, q1 = pl.pallas_call(
        _stats1_kernel,
        grid=(T,),
        out_shape=(jax.ShapeDtypeStruct((T, 1, H1), f32),
                   jax.ShapeDtypeStruct((T, 1, H1), f32)),
        in_specs=[char_spec, const_spec((Pc, H1)), const_spec((1, H1))],
        out_specs=(stat1_spec, stat1_spec),
        compiler_params=grid_params,
    )(char_c, w1, b1)
    mu1 = jnp.sum(s1, axis=(0, 1)) / TN                   # (H1,)
    var1 = jnp.maximum(jnp.sum(q1, axis=(0, 1)) / TN - mu1 * mu1, 0.0)
    sc1 = params["g1"] * lax.rsqrt(var1 + BN_EPS)
    scale1 = sc1.reshape(1, H1).astype(f32)
    shift1 = (params["beta1"] - mu1 * sc1).reshape(1, H1).astype(f32)

    # ---- pass 2: global BN2 batch statistics (recompute layer 1) ----------
    stat2_spec = pl.BlockSpec((1, 1, H2), lambda t: (t, 0, 0))
    s2, q2 = pl.pallas_call(
        _stats2_kernel,
        grid=(T,),
        out_shape=(jax.ShapeDtypeStruct((T, 1, H2), f32),
                   jax.ShapeDtypeStruct((T, 1, H2), f32)),
        in_specs=[char_spec,
                  const_spec((Pc, H1)), const_spec((1, H1)),
                  const_spec((1, H1)), const_spec((1, H1)),
                  const_spec((H1, H2)), const_spec((1, H2))],
        out_specs=(stat2_spec, stat2_spec),
        compiler_params=grid_params,
    )(char_c, w1, b1, scale1, shift1, w2, b2)
    mu2 = jnp.sum(s2, axis=(0, 1)) / TN
    var2 = jnp.maximum(jnp.sum(q2, axis=(0, 1)) / TN - mu2 * mu2, 0.0)
    sc2 = params["g2"] * lax.rsqrt(var2 + BN_EPS)
    scale2 = sc2.reshape(1, H2).astype(f32)
    shift2 = (params["beta2"] - mu2 * sc2).reshape(1, H2).astype(f32)

    # ---- pass 3: fused forward + per-t factor contraction ------------------
    itemsize = jnp.dtype(matmul_dtype).itemsize
    flops = 2 * TN * (Pc * H1 + H1 * H2 + H2 * F + F)
    bytes_accessed = (TN * Pc * itemsize + TN * 4 + T * F * 4
                      + (w1.size + w2.size + w3.size) * itemsize)
    out3 = pl.pallas_call(
        _forward_kernel,
        grid=(T,),
        out_shape=jax.ShapeDtypeStruct((T, 1, N), f32),
        in_specs=[char_spec,
                  pl.BlockSpec((1, 1, F), lambda t: (t, 0, 0)),
                  const_spec((Pc, H1)), const_spec((1, H1)),
                  const_spec((1, H1)), const_spec((1, H1)),
                  const_spec((H1, H2)), const_spec((1, H2)),
                  const_spec((1, H2)), const_spec((1, H2)),
                  const_spec((H2, F)), const_spec((1, F))],
        out_specs=pl.BlockSpec((1, 1, N), lambda t: (t, 0, 0)),
        compiler_params=grid_params,
        cost_estimate=pl.CostEstimate(flops=int(flops), transcendentals=0,
                                      bytes_accessed=int(bytes_accessed)),
    )(char_c, factors3, w1, b1, scale1, shift1, w2, b2, scale2, shift2, w3, b3)

    return out3.reshape(T, N)                             # == squeeze(loadings @ factors)


# ---------------------------------------------------------------------------
# params / reference
# ---------------------------------------------------------------------------
def init_params(key, nb_char, nb_ptfs, nb_fctr):
    """Deterministic init mimicking PyTorch nn.Linear / nn.BatchNorm1d defaults."""
    def linear(key, fan_in, fan_out):
        kw, kb = jax.random.split(key)
        bound = 1.0 / jnp.sqrt(fan_in)
        w = jax.random.uniform(kw, (fan_out, fan_in), jnp.float32, -bound, bound)
        b = jax.random.uniform(kb, (fan_out,), jnp.float32, -bound, bound)
        return w, b

    k1, k2, k3, k4 = jax.random.split(key, 4)
    w1, b1 = linear(k1, nb_char, H1)
    w2, b2 = linear(k2, H1, H2)
    w3, b3 = linear(k3, H2, nb_fctr)
    we, be = linear(k4, nb_ptfs, nb_fctr)
    return dict(
        w1=w1, b1=b1, w2=w2, b2=b2, w3=w3, b3=b3, we=we, be=be,
        g1=jnp.ones((H1,), jnp.float32), beta1=jnp.zeros((H1,), jnp.float32),
        g2=jnp.ones((H2,), jnp.float32), beta2=jnp.zeros((H2,), jnp.float32),
    )


def ae2_reference(char, ptfs, params):
    """Pure-JAX reference of the PyTorch forward (dropout=identity, BN batch stats)."""
    T, N, Pc = char.shape
    x = char.reshape(T * N, Pc)

    def bn(h, g, b):
        mu = jnp.mean(h, axis=0, keepdims=True)
        var = jnp.mean((h - mu) ** 2, axis=0, keepdims=True)
        return (h - mu) / jnp.sqrt(var + BN_EPS) * g + b

    h = x @ params["w1"].T + params["b1"]
    h = jax.nn.relu(bn(h, params["g1"], params["beta1"]))
    h = h @ params["w2"].T + params["b2"]
    h = jax.nn.relu(bn(h, params["g2"], params["beta2"]))
    loadings = (h @ params["w3"].T + params["b3"]).reshape(T, N, -1)     # (T, N, F)
    factors = (ptfs @ params["we"].T + params["be"])[:, :, None]         # (T, F, 1)
    return jnp.squeeze(loadings @ factors)                               # (T, N)


if __name__ == "__main__":
    # Small shapes implied by the forward: char (T, N, nb_char), ptfs (T, nb_ptfs)
    T, N, nb_char, nb_ptfs, nb_fctr = 6, 128, 16, 20, 4

    key = jax.random.PRNGKey(0)
    k_char, k_ptfs, k_par = jax.random.split(key, 3)
    char = jax.random.normal(k_char, (T, N, nb_char), jnp.float32)
    ptfs = jax.random.normal(k_ptfs, (T, nb_ptfs), jnp.float32)
    params = init_params(k_par, nb_char, nb_ptfs, nb_fctr)

    out = jax.block_until_ready(ae2_forward(char, ptfs, params))
    ref = ae2_reference(char, ptfs, params)

    assert out.shape == (T, N), out.shape
    max_err = float(jnp.max(jnp.abs(out - ref)))
    assert jnp.allclose(out, ref, atol=2e-4, rtol=2e-4), max_err
    print("KERNEL_OK")
</pallas_src>

<mosaic_0001>
module attributes {stable_mosaic.version = 11 : i64} {
  func.func @_encoder_kernel(%arg0: memref<6x20xf32, #tpu.memory_space<vmem>>, %arg1: memref<20x4xf32, #tpu.memory_space<vmem>>, %arg2: memref<1x4xf32, #tpu.memory_space<vmem>>, %arg3: memref<6x4xf32, #tpu.memory_space<vmem>>) attributes {dimension_semantics = [], scalar_prefetch = 0 : i64, scratch_operands = 0 : i64, tpu.core_type = #tpu.core_type<tc>} {
    %c0 = arith.constant 0 : index
    %c0_0 = arith.constant 0 : index
    %0 = vector.load %arg0[%c0, %c0_0] : memref<6x20xf32, #tpu.memory_space<vmem>>, vector<6x20xf32>
    %c0_1 = arith.constant 0 : index
    %c0_2 = arith.constant 0 : index
    %1 = vector.load %arg1[%c0_1, %c0_2] : memref<20x4xf32, #tpu.memory_space<vmem>>, vector<20x4xf32>
    %cst = arith.constant dense<0.000000e+00> : vector<6x4xf32>
    %2 = tpu.matmul %0, %1, %cst {dimension_numbers = #tpu.dot_dimension_numbers<[1], [0], [0], [1], [0, 0, 1, 1], [], []>} : vector<6x20xf32>, vector<20x4xf32>, vector<6x4xf32> -> vector<6x4xf32>
    %c0_3 = arith.constant 0 : index
    %c0_4 = arith.constant 0 : index
    %3 = vector.load %arg2[%c0_3, %c0_4] : memref<1x4xf32, #tpu.memory_space<vmem>>, vector<1x4xf32>
    %4 = vector.broadcast %3 : vector<1x4xf32> to vector<6x4xf32>
    %5 = arith.addf %2, %4 : vector<6x4xf32>
    %c0_5 = arith.constant 0 : index
    %c0_6 = arith.constant 0 : index
    %6 = vector.load %arg3[%c0_5, %c0_6] : memref<6x4xf32, #tpu.memory_space<vmem>>, vector<6x4xf32>
    tpu.vector_store %arg3[%c0_5, %c0_6], %5 {strides = array<i32>} : memref<6x4xf32, #tpu.memory_space<vmem>>, vector<6x4xf32>,
    return
  }
}

</mosaic_0001>

<bundles_post_ra>
// kernel: tpu_custom_call.1
= control target key start
LH: loop header
LB: loop body
LE: loop exit
PB: predicated region body
PF: predicated region fallthrough
CT: control target
= control target key end

     0   :  { %vm26_vm0 = vcmask 1043456   ;;  %vm22_vm1 = vcmask 162816   ;;  %vm50_vm2 = vcmask 29696   ;;  %s97_s1 = inlined_call_operand.vmem [shape: f32[20,4], index: 1, kind: input, shape index: {}]   ;;  %s98_s0 = inlined_call_operand.vmem [shape: f32[6,20], index: 0, kind: input, shape index: {}]   ;;  %s99_s2 = inlined_call_operand.vmem [shape: f32[1,4], index: 2, kind: input, shape index: {}]   ;;  %s100_s3 = inlined_call_operand.vmem [shape: f32[6,4], index: 3, kind: output, shape index: {}]  }
   0x1   :  { %v17_v0 = vld [vmem:[%s97_s1 + $0x10] sm:$0xf]  ;;  %v16_v1 = vld [vmem:[%s97_s1 + $0x8] sm:$0xff]  ;;  %v15_v2 = vld [vmem:[%s97_s1] sm:$0xff] }
   0x2   :  { %56 = vmatpush.msk.msra.mxu0 %vm26_vm0, %v17_v0  ;;  %v14_v3 = vld [vmem:[%s98_s0] sm:$0x3f] }
   0x3   :  { %v58_v4 = vld [vmem:[%s99_s2] ss:$0 sm:$0xff] }
   0x4   :  { %44 = vmatpush.msra.mxu0 %v16_v1 }
   0x6   :  { %45 = vmatpush.msra.mxu0 %v15_v2 }
   0x7   :  { %57 = vmatmul.msk.f32.vlgmr.msra.gmra.mxu0 %vm22_vm1, %v14_v3 }
  0x84   :  { %v47_v5 = vpop.f32.mrf.mxu0 }
  0x85   :  { %v48_v6 = vadd.f32 %v58_v4, %v47_v5 }
  0x87   :  { %51 = vst.msk [vmem:[%s100_s3] sm:$0x3f] %vm50_vm2, %v48_v6 }

</bundles_post_ra>
